<compile_context>
chip_gen: v7x
topology: tpu7x:2x2x1
jax: 0.10.0
libtpu: 0.0.40
codegen_flags: <defaults>
</compile_context>

<pallas_src>
import math

import jax
import jax.numpy as jnp
from jax.experimental import pallas as pl
from jax.experimental.pallas import tpu as pltpu

_LANE = 128
_TARGET_STEP_BYTES = 4 * 1024 * 1024   # aim for ~4 MiB of HBM traffic per grid step


def _cdiv(a, b):
    return -(-a // b)


def _round_up(x, m):
    return (x + m - 1) // m * m


def _sublane(itemsize):
    # sublane granularity per dtype width (f32 -> 8, bf16 -> 16, int8/fp8 -> 32)
    return {4: 8, 2: 16, 1: 32}.get(itemsize, 8)


def _vmem_budget_bytes():
    """(vmem_limit_bytes, block_budget_bytes) derived from the chip's VMEM."""
    cap = 64 * 1024 * 1024                         # conservative fallback (v7x per-TC)
    try:
        info = pltpu.get_tpu_info()
        cap = int(getattr(info, "vmem_capacity_bytes", cap) or cap)
    except Exception:
        pass
    # v5e/v6e (128 MiB physical) -> 96 MiB scoped limit; v7x (64 MiB) -> 48 MiB.
    vmem_limit = min((3 * cap) // 4, 96 * 1024 * 1024)
    # Leave headroom for the resident weight/bias buffers + compiler scratch.
    block_budget = (3 * vmem_limit) // 4
    return vmem_limit, block_budget


def _plan_blocks(n, hw, c_in, c_out, itemsize, requested_tile, block_budget):
    """Pick (batch_block nb, spatial tile)."""
    sub = _sublane(itemsize)
    # VMEM bytes per lane column per image (sublane-padded x block + out block).
    col_vmem = itemsize * (_round_up(c_in, sub) + _round_up(c_out, sub))
    # HBM bytes actually moved per lane column per image.
    col_hbm = itemsize * (c_in + c_out)

    # Round the user request down to a 128-lane multiple (lane-dense stores).
    req = max(_LANE, (requested_tile // _LANE) * _LANE)

    img_hbm = hw * col_hbm
    img_vmem = hw * col_vmem

    if 2 * img_hbm <= _TARGET_STEP_BYTES:
        # Small images: take the whole spatial extent and fold batch into the block.
        tile = hw
        nb = min(n,
                 max(1, _TARGET_STEP_BYTES // img_hbm),
                 max(1, block_budget // (2 * img_vmem)))   # 2x: double buffering
    else:
        nb = 1
        max_cols = (block_budget // (2 * col_vmem)) // _LANE * _LANE
        tile = min(req, max(_LANE, max_cols))
        if tile >= hw:
            tile = hw

    # Guarantee >=2 blocks along a parallel axis so both v7x TensorCores get
    # work (costs nothing on single-core v5e/v6e).
    if _cdiv(n, nb) * _cdiv(hw, tile) < 2:
        if hw >= 2 * _LANE:
            tile = max(_LANE, (((hw + 1) // 2) // _LANE) * _LANE)
        elif n >= 2:
            nb = (n + 1) // 2
    return nb, tile


def _outconv_kernel(x_ref, w_ref, b_ref, o_ref):
    # x_ref: (nb, C_in, tile)   w_ref: (C_out, C_in)   b_ref: (C_out, 1)
    # o_ref: (nb, C_out, tile)
    x = x_ref[...]
    w = jnp.broadcast_to(w_ref[...], (x.shape[0],) + w_ref.shape)   # (nb, C_out, C_in)
    acc = jnp.einsum("noc,ncp->nop", w, x, preferred_element_type=jnp.float32)
    o_ref[...] = (acc + b_ref[...]).astype(o_ref.dtype)


def outconv_pallas(x_nchw, weight, bias, *, tile_hw=131072):
    """1x1 conv (NCHW in / NCHW out): out[n,o,h,w] = sum_c W[o,c]*x[n,c,h,w] + b[o].

    x_nchw : (N, C_in, H, W)
    weight : (C_out, C_in, 1, 1)  -- PyTorch Conv2d weight layout
    bias   : (C_out,)
    """
    n, c_in, h, w = x_nchw.shape
    c_out = weight.shape[0]
    hw = h * w

    x3 = x_nchw.reshape(n, c_in, hw)                 # free reshape, no transpose
    w_mat = weight.reshape(c_out, c_in)
    b_mat = bias.reshape(c_out, 1)

    vmem_limit, block_budget = _vmem_budget_bytes()
    nb, tile = _plan_blocks(n, hw, c_in, c_out, x_nchw.dtype.itemsize,
                            tile_hw, block_budget)
    grid = (_cdiv(n, nb), _cdiv(hw, tile))           # ragged tails handled by Pallas

    out = pl.pallas_call(
        _outconv_kernel,
        out_shape=jax.ShapeDtypeStruct((n, c_out, hw), x_nchw.dtype),
        grid_spec=pltpu.PrefetchScalarGridSpec(
            num_scalar_prefetch=0,
            grid=grid,
            in_specs=[
                pl.BlockSpec((nb, c_in, tile), lambda b, s: (b, 0, s)),
                pl.BlockSpec((c_out, c_in), lambda b, s: (0, 0)),   # VMEM-resident weight
                pl.BlockSpec((c_out, 1), lambda b, s: (0, 0)),      # VMEM-resident bias
            ],
            out_specs=pl.BlockSpec((nb, c_out, tile), lambda b, s: (b, 0, s)),
        ),
        compiler_params=pltpu.CompilerParams(
            dimension_semantics=("parallel", "parallel"),
            vmem_limit_bytes=int(vmem_limit),
        ),
    )(x3, w_mat, b_mat)

    return out.reshape(n, c_out, h, w)               # free reshape back to NCHW


def init_outconv_params(key, in_channels, out_channels, dtype=jnp.float32):
    """Deterministic re-implementation of the module's post_init:
    kaiming_uniform_(weight) with default args (a=0, fan_in), bias = 0."""
    fan_in = in_channels * 1 * 1
    gain = math.sqrt(2.0)                  # leaky_relu gain with a=0
    bound = gain * math.sqrt(3.0 / fan_in)
    weight = jax.random.uniform(
        key, (out_channels, in_channels, 1, 1),
        minval=-bound, maxval=bound, dtype=dtype)
    bias = jnp.zeros((out_channels,), dtype=dtype)
    return weight, bias


if __name__ == "__main__":
    key = jax.random.PRNGKey(0)
    k_x, k_w = jax.random.split(key)

    N, C_IN, C_OUT, H, W = 2, 4, 3, 16, 16
    x = jax.random.normal(k_x, (N, C_IN, H, W), dtype=jnp.float32)
    weight, bias = init_outconv_params(k_w, C_IN, C_OUT)

    fwd = jax.jit(outconv_pallas)
    y = fwd(x, weight, bias)
    jax.block_until_ready(y)

    # Reference check against plain-JAX 1x1 conv semantics.
    y_ref = jnp.einsum("nchw,oc->nohw", x, weight.reshape(C_OUT, C_IN)) \
            + bias.reshape(1, C_OUT, 1, 1)
    assert y.shape == (N, C_OUT, H, W)
    assert jnp.allclose(y, y_ref, atol=1e-5, rtol=1e-5)

    print("KERNEL_OK")
</pallas_src>

<mosaic_0001>
module attributes {stable_mosaic.version = 11 : i64} {
  func.func @_outconv_kernel(%arg0: i32, %arg1: i32, %arg2: memref<2x4x128xf32, #tpu.memory_space<vmem>>, %arg3: memref<3x4xf32, #tpu.memory_space<vmem>>, %arg4: memref<3x1xf32, #tpu.memory_space<vmem>>, %arg5: memref<2x3x128xf32, #tpu.memory_space<vmem>>) attributes {dimension_semantics = [#tpu.dimension_semantics<parallel>, #tpu.dimension_semantics<parallel>], iteration_bounds = array<i64: 1, 2>, scalar_prefetch = 0 : i64, scratch_operands = 0 : i64, tpu.core_type = #tpu.core_type<tc>, window_params = [{transform_indices = @transform_0, window_bounds = array<i64: 2, 4, 128>}, {pipeline_mode = #tpu.pipeline_mode<synchronous>, transform_indices = @transform_1, window_bounds = array<i64: 3, 4>}, {pipeline_mode = #tpu.pipeline_mode<synchronous>, transform_indices = @transform_2, window_bounds = array<i64: 3, 1>}, {transform_indices = @transform_3, window_bounds = array<i64: 2, 3, 128>}]} {
    %c0 = arith.constant 0 : index
    %c0_0 = arith.constant 0 : index
    %c0_1 = arith.constant 0 : index
    %0 = vector.load %arg2[%c0, %c0_0, %c0_1] : memref<2x4x128xf32, #tpu.memory_space<vmem>>, vector<2x4x128xf32>
    %c0_2 = arith.constant 0 : index
    %c0_3 = arith.constant 0 : index
    %1 = vector.load %arg3[%c0_2, %c0_3] : memref<3x4xf32, #tpu.memory_space<vmem>>, vector<3x4xf32>
    %2 = vector.shape_cast %1 : vector<3x4xf32> to vector<1x3x4xf32>
    %3 = vector.broadcast %2 : vector<1x3x4xf32> to vector<2x3x4xf32>
    "tpu.trace_start"() <{level = 10 : i32, message = "noc,ncp->nop"}> : () -> ()
    %cst = arith.constant dense<0.000000e+00> : vector<2x3x128xf32>
    %4 = tpu.matmul %3, %0, %cst {dimension_numbers = #tpu.dot_dimension_numbers<[2], [1], [1], [2], [0, 0, 0, 1, 1, 2], [0], [0]>} : vector<2x3x4xf32>, vector<2x4x128xf32>, vector<2x3x128xf32> -> vector<2x3x128xf32>
    "tpu.trace_stop"() : () -> ()
    %c0_4 = arith.constant 0 : index
    %c0_5 = arith.constant 0 : index
    %5 = vector.load %arg4[%c0_4, %c0_5] : memref<3x1xf32, #tpu.memory_space<vmem>>, vector<3x1xf32>
    %6 = vector.shape_cast %5 : vector<3x1xf32> to vector<1x3x1xf32>
    %7 = vector.broadcast %6 : vector<1x3x1xf32> to vector<2x3x128xf32>
    %8 = arith.addf %4, %7 : vector<2x3x128xf32>
    %c0_6 = arith.constant 0 : index
    %c0_7 = arith.constant 0 : index
    %c0_8 = arith.constant 0 : index
    %9 = vector.load %arg5[%c0_6, %c0_7, %c0_8] : memref<2x3x128xf32, #tpu.memory_space<vmem>>, vector<2x3x128xf32>
    tpu.vector_store %arg5[%c0_6, %c0_7, %c0_8], %8 {strides = array<i32>} : memref<2x3x128xf32, #tpu.memory_space<vmem>>, vector<2x3x128xf32>,
    return
  }
  func.func @transform_0(%arg0: i32, %arg1: i32) -> (i32, i32, i32) {
    %c0_i32 = arith.constant 0 : i32
    %c0_i32_0 = arith.constant 0 : i32
    return %arg0, %c0_i32, %arg1 : i32, i32, i32
  }
  func.func @transform_1(%arg0: i32, %arg1: i32) -> (i32, i32) {
    %c0_i32 = arith.constant 0 : i32
    %c0_i32_0 = arith.constant 0 : i32
    %c0_i32_1 = arith.constant 0 : i32
    return %c0_i32, %c0_i32_0 : i32, i32
  }
  func.func @transform_2(%arg0: i32, %arg1: i32) -> (i32, i32) {
    %c0_i32 = arith.constant 0 : i32
    %c0_i32_0 = arith.constant 0 : i32
    %c0_i32_1 = arith.constant 0 : i32
    return %c0_i32, %c0_i32_0 : i32, i32
  }
  func.func @transform_3(%arg0: i32, %arg1: i32) -> (i32, i32, i32) {
    %c0_i32 = arith.constant 0 : i32
    %c0_i32_0 = arith.constant 0 : i32
    return %arg0, %c0_i32, %arg1 : i32, i32, i32
  }
}

</mosaic_0001>

<bundles_post_ra>
// kernel: outconv_pallas.1
= control target key start
LH: loop header
LB: loop body
LE: loop exit
PB: predicated region body
PF: predicated region fallthrough
CT: control target
= control target key end

     0   :  { %s655_s12 = smov 0   ;;  %s657_s13 = smov 0   ;;  %s733_s0 = inlined_call_operand.vmem [shape: f32[2,4,256], index: 0, kind: input, shape index: {}]   ;;  %s734_s1 = inlined_call_operand.vmem [shape: f32[3,4], index: 1, kind: input, shape index: {}]   ;;  %s735_s2 = inlined_call_operand.vmem [shape: f32[3,1], index: 2, kind: input, shape index: {}]   ;;  %s736_s3 = inlined_call_operand.vmem [shape: f32[2,3,256], index: 3, kind: output, shape index: {}]  }
   0x1   :  { %s659_s14 = smov 0   ;;  %s661_s15 = smov 0  }
   0x2   :  { %s663_s16 = smov 0  }
   0x3 LB: > { %s22_s17 = sadd.s32 1, %s626_s15  ;;  %s517_s18 = sadd.s32 4294967295, %s630_s16   ;;  %s630_s16 = sphi %s663_s16, %s13_s16   ;;  %s626_s15 = sphi %s661_s15, %s741_s15   ;;  %s622_s14 = sphi %s659_s14, %s740_s14   ;;  %s618_s13 = sphi %s657_s13, %s739_s13   ;;  %s614_s12 = sphi %s655_s12, %s738_s12  }
   0x4   : > { %p23_p0 = scmp.ge.s32.totalorder %s22_s17, 2  ;;  %p41_p1 = scmp.ne.s32.totalorder %s618_s13, %s614_s12 }
   0x5   : > { %p42_p2 = scmp.eq.s32.totalorder %s630_s16, 0  ;;  %p115_p4 = scmp.eq.s32.totalorder %s517_s18, 1 }
   0x6   : > { %s743_s17 = smov (%p23_p0, %s22_s17), 0  ;;  %s34_s20 = sadd.s32 1, %s618_s13 }
   0x7   : > { %p43_p3 = por %p42_p2, %p41_p1  ;;  %s30_s19 = ssub.s32 %s626_s15, %s743_s17 }
   0x8   : > { %p32_p5 = scmp.eq.s32.totalorder %s30_s19, 0  ;;  %p690_p6 = por %p115_p4, %p41_p1 }
   0x9   : > { %p520_p7 = scmp.ge.s32.totalorder %s630_s16, 2 }
   0xa   : > { %s695_s22 = scalar_select %p32_p5, %s618_s13, %s34_s20  }
   0xb   : > { %143 = sbr.rel (%p520_p7) target bundleno = 25 (0x19), region = 24 }
  0x12   : > { %146 = sbr.rel (!%p43_p3) target bundleno = 25 (0x19), region = 28  ;;  %s148_s23 = sand.u32 (%p43_p3), 1, %s618_s13  }
  0x13   : > { %s522_s24 = sshll.u32 (%p43_p3), %s626_s15, 2  ;;  %s521_s25 = sshll.u32 (%p43_p3), %s148_s23, 3 }
  0x14   : > { %s155_s28 = scalar_lea.vmem (%p43_p3), %s733_s0, %s522_s24  ;;  %s150_s29 = scalar_lea.vmem (%p43_p3), [#allocation2], %s521_s25 }
  0x15   : > { %v171_v0 = vld [vmem:[%s155_s28] sm:$0xf] (%p43_p3)  ;;  %v173_v1 = vld [vmem:[%s155_s28 + $0x8] sm:$0xf] (%p43_p3) }
  0x16   : > { %172 = vst [vmem:[%s150_s29] sm:$0xf] (%p43_p3), %v171_v0  ;;  %174 = vst [vmem:[%s150_s29 + $0x4] sm:$0xf] (%p43_p3), %v173_v1 }
  0x19 PF: > { %p523_p8 = scmp.ge.s32.totalorder %s630_s16, 1  ;;  %p200_p9 = scmp.lt.s32.totalorder %s630_s16, 3 }
  0x1b   : > { %p201_p10 = pnand %p523_p8, %p200_p9 }
  0x1c   : > { %s207_s30 = sand.u32 (!%p201_p10), 1, %s614_s12   ;;  %v632_v2 = vmov (!%p201_p10), 0.0   ;;  %vm244_vm0 = vcmask (!%p201_p10), 1043456   ;;  %vm633_vm1 = vmmov (!%p201_p10), 0   ;;  %v233_v3 = vld [vmem:[%s734_s1] sm:$0x7] (!%p201_p10) }
  0x1d   : > { %204 = sbr.rel (%p201_p10) target bundleno = 256 (0x100), region = 69  ;;  %538 = vmatprep.subr.mxu0 (!%p201_p10), %v632_v2  ;;  %543 = vmatprep.subr.mxu1 (!%p201_p10), %v632_v2  ;;  %s524_s4 = sshll.u32 (!%p201_p10), %s207_s30, 3  ;;  %vm240_vm2 = vcmask (!%p201_p10), 31744   ;;  %v634_v6 = vmov (!%p201_p10), 0   ;;  %v234_v7 = vld [vmem:[%s735_s2] sm:$0x7] (!%p201_p10) }
  0x1e   : > { %540 = vmatprep.mubr.msk.f32.mxu0 (!%p201_p10), %vm633_vm1, %v632_v2  ;;  %545 = vmatprep.mubr.msk.f32.mxu1 (!%p201_p10), %vm633_vm1, %v632_v2  ;;  %s209_s7 = scalar_lea.vmem (!%p201_p10), [#allocation2], %s524_s4  ;;  %s228_s10 = scalar_lea.vmem (!%p201_p10), [#allocation3], %s524_s4 }
  0x1f   : > { %v231_v4 = vld [vmem:[%s209_s7] sm:$0xf] (!%p201_p10)  ;;  %v232_v5 = vld [vmem:[%s209_s7 + $0x4] sm:$0xf] (!%p201_p10)  ;;  %591 = vset.pattern.permute.xlu0 (!%p201_p10), %v634_v6 }
  0x20   : > { %539 = vmatpush3.msk.msra.mxu0 (!%p201_p10), %vm244_vm0, %v231_v4  ;;  %544 = vmatpush3.msk.msra.mxu1 (!%p201_p10), %vm244_vm0, %v232_v5 }
  0x21   : > { %541 = vmatmul.mubr.msk.f32.vlgmr.msra.gmra.mrb[0].mxu0 (!%p201_p10), %vm240_vm2, %v233_v3  ;;  %546 = vmatmul.mubr.msk.f32.vlgmr.msra.gmra.mrb[0].mxu1 (!%p201_p10), %vm240_vm2, %v233_v3 }
  0x22   : > { %237 = vperm.xlu0 (!%p201_p10), %591, %v234_v7  }
  0x24   : > { %s531_s11 = sshll.u32 (%p690_p6), %s622_s14, 2 }
  0x25   : > { %s404_s19 = scalar_lea.vmem (%p690_p6), %s736_s3, %s531_s11 }
  0xa1   : > { %v238_v8 = vpop.permute.xlu0 %237 }
  0xf1   : > { %399 = sbr.rel (!%p690_p6) target bundleno = 256 (0x100), region = 77 }
  0xf4   : > { %v314_v9 = vpop.f32.mrb[0].mxu0  ;;  %v387_v10 = vpop.f32.mrb[0].mxu1 }
  0xf5   : > { %v315_v11 = vadd.f32 %v314_v9, %v238_v8  ;;  %v388_v12 = vadd.f32 %v387_v10, %v238_v8  ;;  %v542_v13 = vpop.f32.mrb[1].mxu0  ;;  %v547_v14 = vpop.f32.mrb[1].mxu1 }
  0xf7   : > { %391 = vst [vmem:[%s228_s10] sm:$0x7] %v315_v11  ;;  %392 = vst [vmem:[%s228_s10 + $0x4] sm:$0x7] %v388_v12 }
  0xfe   : > { %v420_v15 = vld [vmem:[%s228_s10] sm:$0xf]  ;;  %v422_v16 = vld [vmem:[%s228_s10 + $0x4] sm:$0xf] }
  0xff   : > { %421 = vst [vmem:[%s404_s19] sm:$0xf] %v420_v15  ;;  %423 = vst [vmem:[%s404_s19 + $0x8] sm:$0xf] %v422_v16 }
 0x100 PF: > { %s13_s16 = sadd.s32 1, %s630_s16   ;;  %s738_s12 = smov %s618_s13 }
 0x101   : > { %p10_p11 = scmp.ge.s32.totalorder %s13_s16, 4   ;;  %s739_s13 = smov %s695_s22 }
 0x102   : > { %s740_s14 = smov %s626_s15  ;;  %s741_s15 = smov %s743_s17 }
 0x103   :  { %12 = sbr.rel (!%p10_p11) target bundleno = 3 (0x3), region = 149 }

</bundles_post_ra>
